<compile_context>
chip_gen: v5e
topology: v5e:2x2
jax: 0.10.0
libtpu: 0.0.40
codegen_flags: <defaults>
</compile_context>

<pallas_src>
import functools

import jax
import jax.numpy as jnp
from jax.experimental import pallas as pl
from jax.experimental.pallas import tpu as pltpu


def _layer_norm(y, g, b, eps=1e-5):
    """f32 LayerNorm used both in-kernel and in the pure-JAX reference."""
    mean = jnp.mean(y, axis=-1, keepdims=True)
    var = jnp.mean((y - mean) ** 2, axis=-1, keepdims=True)
    return (y - mean) * jax.lax.rsqrt(var + eps) * g + b


# ---------------------------------------------------------------------------
# Kernel 1: token embedding + L2 normalization (over the T axis) + pos embed
# Single grid step over the whole (B, T, C) input (it is tiny).
# ---------------------------------------------------------------------------
def _embed_kernel(x_ref, wt_ref, bt_ref, pos_ref, o_ref):
    for b in range(x_ref.shape[0]):                             # static unroll over B
        y = jnp.dot(x_ref[b], wt_ref[...],
                    preferred_element_type=jnp.float32) + bt_ref[...]
        # F.normalize(p=2, dim=1) on a (B, T, E) tensor normalizes along T.
        norm = jnp.sqrt(jnp.sum(y * y, axis=0, keepdims=True))
        y = y / jnp.maximum(norm, 1e-12)
        o_ref[b] = (y + pos_ref[...]).astype(o_ref.dtype)


def embed_pallas(x, wt, bt, pos):
    B, T, C = x.shape
    E = wt.shape[1]
    return pl.pallas_call(
        _embed_kernel,
        out_shape=jax.ShapeDtypeStruct((B, T, E), jnp.float32),
        grid_spec=pltpu.PrefetchScalarGridSpec(
            num_scalar_prefetch=0,
            grid=(1,),                                           # one step, no per-batch overhead
            in_specs=[
                pl.BlockSpec((B, T, C), lambda i: (0, 0, 0)),    # x (full)
                pl.BlockSpec((C, E), lambda i: (0, 0)),          # token-embed weight
                pl.BlockSpec((1, E), lambda i: (0, 0)),          # token-embed bias
                pl.BlockSpec((T, E), lambda i: (0, 0)),          # positional table
            ],
            out_specs=pl.BlockSpec((B, T, E), lambda i: (0, 0, 0)),
        ),
        compiler_params=pltpu.CompilerParams(
            dimension_semantics=("arbitrary",),
            vmem_limit_bytes=4 * 1024 * 1024,
        ),
    )(x, wt, bt.reshape(1, E), pos)


# ---------------------------------------------------------------------------
# Kernel 2: one fused attention block per grid step (per batch element):
#   qkv  = x @ Wqkv + bqkv                 (single bf16 (E,3E) matmul)
#   att  = concat_h softmax(q_h k_h^T / sqrt(E)) v_h
#   inter= LN1(x + att @ Wo + bo)          (single bf16 (E,E) matmul)
#   ffn  = ReLU(x @ W1 + b1) @ W2 + b2     (fully resident bf16 W1/W2)
#   out  = LN2(ffn + inter)
# ---------------------------------------------------------------------------
def _block_kernel(n_heads, x_ref, wqkv_ref, bqkv_ref, wo_ref, bo_ref,
                  g1_ref, be1_ref, w1_ref, b1_ref, w2_ref, b2_ref,
                  g2_ref, be2_ref, o_ref):
    x = x_ref[...]                                               # (T, E) f32
    T, E = x.shape
    hs = E // n_heads
    scale = E ** (-0.5)                                          # torch: C ** (-0.5), C == n_embd
    xb = x.astype(jnp.bfloat16)                                  # bf16 MXU operand, f32 accum

    # Fused QKV projection: one full-width bf16 matmul instead of 12 tiny ones.
    qkv = jnp.dot(xb, wqkv_ref[...],
                  preferred_element_type=jnp.float32) + bqkv_ref[...]   # (T, 3E)

    # Per-head attention (softmax in f32); heads statically unrolled.
    head_outs = []
    for h in range(n_heads):
        q = qkv[:, h * hs:(h + 1) * hs]
        k = qkv[:, E + h * hs:E + (h + 1) * hs]
        v = qkv[:, 2 * E + h * hs:2 * E + (h + 1) * hs]
        wei = jax.lax.dot_general(q, k, (((1,), (1,)), ((), ())),
                                  preferred_element_type=jnp.float32) * scale
        wei = wei - jnp.max(wei, axis=-1, keepdims=True)
        p = jnp.exp(wei)
        wei = p / jnp.sum(p, axis=-1, keepdims=True)
        head_outs.append(jnp.dot(wei, v, preferred_element_type=jnp.float32))
    att = jnp.concatenate(head_outs, axis=-1)                    # (T, E)

    # Output projection as one full-K (E) bf16 matmul + residual + LayerNorm1.
    proj = jnp.dot(att.astype(jnp.bfloat16), wo_ref[...],
                   preferred_element_type=jnp.float32) + bo_ref[...]
    inter = _layer_norm(x + proj, g1_ref[...], be1_ref[...])

    # Feedforward on the BLOCK INPUT x (per the torch module).
    # nn.Dropout(p=0.3) in eval mode == identity.
    hid = jnp.dot(xb, w1_ref[...], preferred_element_type=jnp.float32) + b1_ref[...]
    hid = jnp.maximum(hid, 0.0)                                  # ReLU
    ff = jnp.dot(hid.astype(jnp.bfloat16), w2_ref[...],
                 preferred_element_type=jnp.float32) + b2_ref[...]

    out = _layer_norm(ff + inter, g2_ref[...], be2_ref[...])     # LayerNorm2
    o_ref[...] = out.astype(o_ref.dtype)


def attention_block_pallas(x, bp, n_heads):
    B, T, E = x.shape
    Hd = bp["w1_bf16"].shape[1]

    weight_bytes = int(sum(bp[k].size * bp[k].dtype.itemsize
                           for k in ("wqkv_bf16", "wo_bf16", "w1_bf16", "w2_bf16")))
    # TODO(synk): if per-block bf16 weights ever exceed a few MiB (large Hd on
    # v7x's 64 MiB VMEM), fall back to a hidden-dim-streamed FFN kernel
    # ("arbitrary" trailing grid axis + f32 VMEM accumulator) instead of this
    # fully-resident fused kernel.
    vmem_limit = int(2 * (weight_bytes + 2 * T * E * 4) + 4 * 1024 * 1024)

    cost = pl.CostEstimate(
        flops=int(B * (2 * T * E * 3 * E            # QKV projection
                       + 2 * 2 * T * T * E          # q@k^T + wei@v over all heads
                       + 2 * T * E * E              # output projection
                       + 2 * 2 * T * E * Hd)),      # FFN matmuls
        transcendentals=int(B * (n_heads * T * T + 4 * T)),
        bytes_accessed=int(weight_bytes + 2 * B * T * E * 4),
    )

    def full(shape):
        n = len(shape)
        return pl.BlockSpec(shape, lambda b: (0,) * n)

    return pl.pallas_call(
        functools.partial(_block_kernel, n_heads),
        out_shape=jax.ShapeDtypeStruct((B, T, E), jnp.float32),
        grid_spec=pltpu.PrefetchScalarGridSpec(
            num_scalar_prefetch=0,
            grid=(B,),                                           # >=2 parallel steps (v7x 2 TCs)
            in_specs=[
                pl.BlockSpec((None, T, E), lambda b: (b, 0, 0)), # x tile (per batch)
                full((E, 3 * E)),                                # Wqkv (bf16)
                full((1, 3 * E)),                                # bqkv
                full((E, E)),                                    # Wo (bf16)
                full((1, E)),                                    # bo
                full((1, E)), full((1, E)),                      # layernorm1 gamma/beta
                full((E, Hd)), full((1, Hd)),                    # W1 (bf16), b1
                full((Hd, E)), full((1, E)),                     # W2 (bf16), b2
                full((1, E)), full((1, E)),                      # layernorm2 gamma/beta
            ],
            out_specs=pl.BlockSpec((None, T, E), lambda b: (b, 0, 0)),
        ),
        compiler_params=pltpu.CompilerParams(
            dimension_semantics=("parallel",),
            vmem_limit_bytes=vmem_limit,
        ),
        cost_estimate=cost,
    )(x,
      bp["wqkv_bf16"], bp["bqkv"].reshape(1, 3 * E),
      bp["wo_bf16"], bp["bo"].reshape(1, E),
      bp["g1"].reshape(1, E), bp["be1"].reshape(1, E),
      bp["w1_bf16"], bp["b1"].reshape(1, Hd),
      bp["w2_bf16"], bp["b2"].reshape(1, E),
      bp["g2"].reshape(1, E), bp["be2"].reshape(1, E))


# ---------------------------------------------------------------------------
# Kernel 3: Dense head = Flatten -> Linear(4096, 256) -> Dropout(eval) -> LeakyReLU
# bf16 weight, N split into 128-wide lane-dense tiles on a "parallel" grid.
# ---------------------------------------------------------------------------
def _dense_kernel(x_ref, wd_ref, bd_ref, o_ref):
    xb = x_ref[...].astype(jnp.bfloat16)                         # bf16 MXU operand
    z = jnp.dot(xb, wd_ref[...], preferred_element_type=jnp.float32) + bd_ref[...]
    # nn.Dropout(p=0.3) eval == identity; LeakyReLU default negative_slope=0.01.
    o_ref[...] = jnp.where(z >= 0.0, z, 0.01 * z).astype(o_ref.dtype)


def dense_pallas(x_flat, wd_bf16, bd):
    Bf, Fin = x_flat.shape
    Nout = wd_bf16.shape[1]
    block_n = 128 if Nout % 128 == 0 else Nout                   # lane-dense output tiles
    n_tiles = Nout // block_n

    cost = pl.CostEstimate(
        flops=int(2 * Bf * Fin * Nout),
        transcendentals=0,
        bytes_accessed=int(wd_bf16.size * 2 + Bf * Fin * 4 + Bf * Nout * 4),
    )

    return pl.pallas_call(
        _dense_kernel,
        out_shape=jax.ShapeDtypeStruct((Bf, Nout), jnp.float32),
        grid_spec=pltpu.PrefetchScalarGridSpec(
            num_scalar_prefetch=0,
            grid=(n_tiles,),                                     # 2 parallel tiles -> both v7x TCs
            in_specs=[
                pl.BlockSpec((Bf, Fin), lambda n: (0, 0)),
                pl.BlockSpec((Fin, block_n), lambda n: (0, n)),  # stream half of Wd per tile
                pl.BlockSpec((1, block_n), lambda n: (0, n)),
            ],
            out_specs=pl.BlockSpec((Bf, block_n), lambda n: (0, n)),
        ),
        compiler_params=pltpu.CompilerParams(
            dimension_semantics=("parallel",),
            vmem_limit_bytes=8 * 1024 * 1024,
        ),
        cost_estimate=cost,
    )(x_flat, wd_bf16, bd.reshape(1, Nout))


# ---------------------------------------------------------------------------
# Full blockblock forward (Pallas) and pure-JAX reference
# ---------------------------------------------------------------------------
def blockblock_pallas(x4d, params):
    x = jnp.squeeze(x4d)                                         # torch.squeeze(x)
    y = embed_pallas(x, params["wt"], params["bt"], params["pos"])
    # Inter-kernel activations stay f32 (tiny at these shapes); bf16 casts
    # happen in-kernel at the MXU operand boundaries.
    for bp in params["blocks"]:
        y = attention_block_pallas(y, bp, params["n_heads"])     # LN2(FFN(x)+LN1(x+MHA(x)))
    B, T, E = y.shape
    return dense_pallas(y.reshape(B, T * E), params["wd_bf16"], params["bd"])


def blockblock_ref(x4d, params):
    """Pure-JAX reference mirroring the PyTorch forward (f32 math, using the
    bf16-rounded weights as the effective f32 weights)."""
    x = jnp.squeeze(x4d)
    y = x @ params["wt"] + params["bt"]
    norm = jnp.sqrt(jnp.sum(y * y, axis=1, keepdims=True))       # F.normalize(dim=1) -> T axis
    y = y / jnp.maximum(norm, 1e-12)
    y = y + params["pos"][None]
    n_heads = params["n_heads"]
    for bp in params["blocks"]:
        E = y.shape[-1]
        hs = E // n_heads
        qkv = y @ bp["wqkv"] + bp["bqkv"]
        outs = []
        for h in range(n_heads):
            q = qkv[..., h * hs:(h + 1) * hs]
            k = qkv[..., E + h * hs:E + (h + 1) * hs]
            v = qkv[..., 2 * E + h * hs:2 * E + (h + 1) * hs]
            wei = jnp.einsum("btd,bsd->bts", q, k) * (E ** -0.5)
            wei = jax.nn.softmax(wei, axis=-1)
            outs.append(jnp.einsum("bts,bsd->btd", wei, v))
        att = jnp.concatenate(outs, axis=-1)
        inter = _layer_norm(y + att @ bp["wo"] + bp["bo"], bp["g1"], bp["be1"])
        hid = jnp.maximum(y @ bp["w1"] + bp["b1"], 0.0)
        ff = hid @ bp["w2"] + bp["b2"]
        y = _layer_norm(ff + inter, bp["g2"], bp["be2"])
    y_flat = y.reshape(y.shape[0], -1)
    z = y_flat @ params["wd"] + params["bd"]
    return jnp.where(z >= 0.0, z, 0.01 * z)


if __name__ == "__main__":
    # Small demo shapes consistent with the module:
    #   input (B, 1, T, n_channels); torch.squeeze -> (B, T, n_channels)
    #   T * n_embd must equal 4096 for Dense's nn.Linear(4096, 256).
    B, T, C_in = 2, 16, 32
    E = 256                       # n_embd (multiple of 128 -> lane-dense)
    n_heads = 4
    num_repeat = 2
    Hd = 4 * E                    # feedforward hidden width
    DENSE_IN, DENSE_OUT = T * E, 256
    assert DENSE_IN == 4096       # matches nn.Linear(4096, 256) in Dense

    key = jax.random.PRNGKey(0)
    keys = iter(jax.random.split(key, 64))

    def uniform(k, shape, fan_in):
        lim = 1.0 / (fan_in ** 0.5)
        return jax.random.uniform(k, shape, minval=-lim, maxval=lim,
                                  dtype=jnp.float32)

    def bf16_pair(k, shape, fan_in):
        # Kernel weight (bf16) and the matching effective f32 reference weight.
        w = uniform(k, shape, fan_in).astype(jnp.bfloat16)
        return w, w.astype(jnp.float32)

    x4d = jax.random.normal(next(keys), (B, 1, T, C_in), dtype=jnp.float32)

    wd_bf16, wd = bf16_pair(next(keys), (DENSE_IN, DENSE_OUT), DENSE_IN)
    params = {
        "n_heads": n_heads,
        "wt": uniform(next(keys), (C_in, E), C_in),      # token-embedding Linear (in, out)
        "bt": uniform(next(keys), (E,), C_in),
        "pos": jax.random.normal(next(keys), (T, E), dtype=jnp.float32),
        "wd_bf16": wd_bf16, "wd": wd,
        "bd": uniform(next(keys), (DENSE_OUT,), DENSE_IN),
        "blocks": [],
    }
    for _ in range(num_repeat):
        wqkv_bf16, wqkv = bf16_pair(next(keys), (E, 3 * E), E)   # q|k|v heads concatenated
        wo_bf16, wo = bf16_pair(next(keys), (E, E), E)           # linlay weight
        w1_bf16, w1 = bf16_pair(next(keys), (E, Hd), E)
        w2_bf16, w2 = bf16_pair(next(keys), (Hd, E), Hd)
        bp = {
            "wqkv_bf16": wqkv_bf16, "wqkv": wqkv,
            "bqkv": uniform(next(keys), (3 * E,), E),
            "wo_bf16": wo_bf16, "wo": wo,
            "bo": uniform(next(keys), (E,), E),
            "g1": 1.0 + 0.05 * jax.random.normal(next(keys), (E,), dtype=jnp.float32),
            "be1": 0.05 * jax.random.normal(next(keys), (E,), dtype=jnp.float32),
            "w1_bf16": w1_bf16, "w1": w1,
            "b1": uniform(next(keys), (Hd,), E),
            "w2_bf16": w2_bf16, "w2": w2,
            "b2": uniform(next(keys), (E,), Hd),
            "g2": 1.0 + 0.05 * jax.random.normal(next(keys), (E,), dtype=jnp.float32),
            "be2": 0.05 * jax.random.normal(next(keys), (E,), dtype=jnp.float32),
        }
        params["blocks"].append(bp)

    out = blockblock_pallas(x4d, params)
    jax.block_until_ready(out)

    ref = blockblock_ref(x4d, params)
    assert out.shape == (B, DENSE_OUT)
    max_err = float(jnp.max(jnp.abs(out - ref)))
    # bf16 MXU operands (weights caller-side, activations cast in-kernel) ->
    # loosened tolerance vs the pure-f32 reference.
    assert jnp.allclose(out, ref, atol=3e-2, rtol=3e-2), (
        f"mismatch vs reference (max abs err {max_err:.4e})")

    print("KERNEL_OK")
</pallas_src>

<mosaic_0001>
module attributes {stable_mosaic.version = 11 : i64} {
  func.func @_embed_kernel(%arg0: i32, %arg1: memref<2x16x32xf32, #tpu.memory_space<vmem>>, %arg2: memref<32x256xf32, #tpu.memory_space<vmem>>, %arg3: memref<1x256xf32, #tpu.memory_space<vmem>>, %arg4: memref<16x256xf32, #tpu.memory_space<vmem>>, %arg5: memref<2x16x256xf32, #tpu.memory_space<vmem>>) attributes {dimension_semantics = [#tpu.dimension_semantics<arbitrary>], iteration_bounds = array<i64: 1>, scalar_prefetch = 0 : i64, scratch_operands = 0 : i64, tpu.core_type = #tpu.core_type<tc>, window_params = [{pipeline_mode = #tpu.pipeline_mode<synchronous>, transform_indices = @transform_0, window_bounds = array<i64: 2, 16, 32>}, {pipeline_mode = #tpu.pipeline_mode<synchronous>, transform_indices = @transform_1, window_bounds = array<i64: 32, 256>}, {pipeline_mode = #tpu.pipeline_mode<synchronous>, transform_indices = @transform_2, window_bounds = array<i64: 1, 256>}, {pipeline_mode = #tpu.pipeline_mode<synchronous>, transform_indices = @transform_3, window_bounds = array<i64: 16, 256>}, {pipeline_mode = #tpu.pipeline_mode<synchronous>, transform_indices = @transform_4, window_bounds = array<i64: 2, 16, 256>}]} {
    %c0 = arith.constant 0 : index
    %c0_0 = arith.constant 0 : index
    %c0_1 = arith.constant 0 : index
    %0 = vector.load %arg1[%c0, %c0_0, %c0_1] : memref<2x16x32xf32, #tpu.memory_space<vmem>>, vector<1x16x32xf32>
    %1 = vector.shape_cast %0 : vector<1x16x32xf32> to vector<16x32xf32>
    %c0_2 = arith.constant 0 : index
    %c0_3 = arith.constant 0 : index
    %2 = vector.load %arg2[%c0_2, %c0_3] : memref<32x256xf32, #tpu.memory_space<vmem>>, vector<32x256xf32>
    %cst = arith.constant dense<0.000000e+00> : vector<16x256xf32>
    %3 = tpu.matmul %1, %2, %cst {dimension_numbers = #tpu.dot_dimension_numbers<[1], [0], [0], [1], [0, 0, 1, 1], [], []>} : vector<16x32xf32>, vector<32x256xf32>, vector<16x256xf32> -> vector<16x256xf32>
    %c0_4 = arith.constant 0 : index
    %c0_5 = arith.constant 0 : index
    %4 = vector.load %arg3[%c0_4, %c0_5] : memref<1x256xf32, #tpu.memory_space<vmem>>, vector<1x256xf32>
    %5 = vector.broadcast %4 : vector<1x256xf32> to vector<16x256xf32>
    %6 = arith.addf %3, %5 : vector<16x256xf32>
    %7 = arith.mulf %6, %6 : vector<16x256xf32>
    %cst_6 = arith.constant dense<0.000000e+00> : vector<256xf32>
    %8 = vector.multi_reduction <add>, %7, %cst_6 [0] : vector<16x256xf32> to vector<256xf32>
    %9 = vector.shape_cast %8 : vector<256xf32> to vector<1x256xf32>
    %10 = math.sqrt %9 : vector<1x256xf32>
    %cst_7 = arith.constant 9.99999996E-13 : f32
    %11 = vector.broadcast %cst_7 : f32 to vector<1x256xf32>
    %12 = arith.maximumf %10, %11 : vector<1x256xf32>
    %13 = vector.broadcast %12 : vector<1x256xf32> to vector<16x256xf32>
    %14 = arith.divf %6, %13 : vector<16x256xf32>
    %c0_8 = arith.constant 0 : index
    %c0_9 = arith.constant 0 : index
    %15 = vector.load %arg4[%c0_8, %c0_9] : memref<16x256xf32, #tpu.memory_space<vmem>>, vector<16x256xf32>
    %16 = arith.addf %14, %15 : vector<16x256xf32>
    %c0_10 = arith.constant 0 : index
    %c0_11 = arith.constant 0 : index
    %c0_12 = arith.constant 0 : index
    %17 = vector.load %arg5[%c0_10, %c0_11, %c0_12] : memref<2x16x256xf32, #tpu.memory_space<vmem>>, vector<1x16x256xf32>
    %18 = vector.shape_cast %17 : vector<1x16x256xf32> to vector<16x256xf32>
    %19 = vector.shape_cast %16 : vector<16x256xf32> to vector<1x16x256xf32>
    tpu.vector_store %arg5[%c0_10, %c0_11, %c0_12], %19 {strides = array<i32>} : memref<2x16x256xf32, #tpu.memory_space<vmem>>, vector<1x16x256xf32>,
    %c1 = arith.constant 1 : index
    %c0_13 = arith.constant 0 : index
    %c0_14 = arith.constant 0 : index
    %20 = vector.load %arg1[%c1, %c0_13, %c0_14] : memref<2x16x32xf32, #tpu.memory_space<vmem>>, vector<1x16x32xf32>
    %21 = vector.shape_cast %20 : vector<1x16x32xf32> to vector<16x32xf32>
    %c0_15 = arith.constant 0 : index
    %c0_16 = arith.constant 0 : index
    %22 = vector.load %arg2[%c0_15, %c0_16] : memref<32x256xf32, #tpu.memory_space<vmem>>, vector<32x256xf32>
    %cst_17 = arith.constant dense<0.000000e+00> : vector<16x256xf32>
    %23 = tpu.matmul %21, %22, %cst_17 {dimension_numbers = #tpu.dot_dimension_numbers<[1], [0], [0], [1], [0, 0, 1, 1], [], []>} : vector<16x32xf32>, vector<32x256xf32>, vector<16x256xf32> -> vector<16x256xf32>
    %c0_18 = arith.constant 0 : index
    %c0_19 = arith.constant 0 : index
    %24 = vector.load %arg3[%c0_18, %c0_19] : memref<1x256xf32, #tpu.memory_space<vmem>>, vector<1x256xf32>
    %25 = vector.broadcast %24 : vector<1x256xf32> to vector<16x256xf32>
    %26 = arith.addf %23, %25 : vector<16x256xf32>
    %27 = arith.mulf %26, %26 : vector<16x256xf32>
    %cst_20 = arith.constant dense<0.000000e+00> : vector<256xf32>
    %28 = vector.multi_reduction <add>, %27, %cst_20 [0] : vector<16x256xf32> to vector<256xf32>
    %29 = vector.shape_cast %28 : vector<256xf32> to vector<1x256xf32>
    %30 = math.sqrt %29 : vector<1x256xf32>
    %cst_21 = arith.constant 9.99999996E-13 : f32
    %31 = vector.broadcast %cst_21 : f32 to vector<1x256xf32>
    %32 = arith.maximumf %30, %31 : vector<1x256xf32>
    %33 = vector.broadcast %32 : vector<1x256xf32> to vector<16x256xf32>
    %34 = arith.divf %26, %33 : vector<16x256xf32>
    %c0_22 = arith.constant 0 : index
    %c0_23 = arith.constant 0 : index
    %35 = vector.load %arg4[%c0_22, %c0_23] : memref<16x256xf32, #tpu.memory_space<vmem>>, vector<16x256xf32>
    %36 = arith.addf %34, %35 : vector<16x256xf32>
    %c1_24 = arith.constant 1 : index
    %c0_25 = arith.constant 0 : index
    %c0_26 = arith.constant 0 : index
    %37 = vector.load %arg5[%c1_24, %c0_25, %c0_26] : memref<2x16x256xf32, #tpu.memory_space<vmem>>, vector<1x16x256xf32>
    %38 = vector.shape_cast %37 : vector<1x16x256xf32> to vector<16x256xf32>
    %39 = vector.shape_cast %36 : vector<16x256xf32> to vector<1x16x256xf32>
    tpu.vector_store %arg5[%c1_24, %c0_25, %c0_26], %39 {strides = array<i32>} : memref<2x16x256xf32, #tpu.memory_space<vmem>>, vector<1x16x256xf32>,
    return
  }
  func.func @transform_0(%arg0: i32) -> (i32, i32, i32) {
    %c0_i32 = arith.constant 0 : i32
    %c0_i32_0 = arith.constant 0 : i32
    %c0_i32_1 = arith.constant 0 : i32
    %c0_i32_2 = arith.constant 0 : i32
    return %c0_i32, %c0_i32_0, %c0_i32_1 : i32, i32, i32
  }
  func.func @transform_1(%arg0: i32) -> (i32, i32) {
    %c0_i32 = arith.constant 0 : i32
    %c0_i32_0 = arith.constant 0 : i32
    %c0_i32_1 = arith.constant 0 : i32
    return %c0_i32, %c0_i32_0 : i32, i32
  }
  func.func @transform_2(%arg0: i32) -> (i32, i32) {
    %c0_i32 = arith.constant 0 : i32
    %c0_i32_0 = arith.constant 0 : i32
    %c0_i32_1 = arith.constant 0 : i32
    return %c0_i32, %c0_i32_0 : i32, i32
  }
  func.func @transform_3(%arg0: i32) -> (i32, i32) {
    %c0_i32 = arith.constant 0 : i32
    %c0_i32_0 = arith.constant 0 : i32
    %c0_i32_1 = arith.constant 0 : i32
    return %c0_i32, %c0_i32_0 : i32, i32
  }
  func.func @transform_4(%arg0: i32) -> (i32, i32, i32) {
    %c0_i32 = arith.constant 0 : i32
    %c0_i32_0 = arith.constant 0 : i32
    %c0_i32_1 = arith.constant 0 : i32
    %c0_i32_2 = arith.constant 0 : i32
    return %c0_i32, %c0_i32_0, %c0_i32_1 : i32, i32, i32
  }
}

</mosaic_0001>

<bundles_post_ra>
// kernel: tpu_custom_call.1
= control target key start
LH: loop header
LB: loop body
LE: loop exit
PB: predicated region body
PF: predicated region fallthrough
CT: control target
= control target key end

     0   :  { %9 = vsyncpa [#allocation3], 0  ;;  %s688_s0 = inlined_call_operand.hbm [shape: f32[2,16,32], index: 0, kind: input, shape index: {}]   ;;  %s689_s1 = inlined_call_operand.hbm [shape: f32[32,256], index: 1, kind: input, shape index: {}]   ;;  %s690_s2 = inlined_call_operand.hbm [shape: f32[1,256], index: 2, kind: input, shape index: {}]   ;;  %s691_s3 = inlined_call_operand.hbm [shape: f32[16,256], index: 3, kind: input, shape index: {}]   ;;  %s692_s4 = inlined_call_operand.hbm [shape: f32[2,16,256], index: 4, kind: output, shape index: {}]  }
   0x1   :  { %10 = vsyncpa [#allocation6], 0 }
   0x2   :  { %11 = vsyncpa [#allocation9], 0  ;;  %s30_s17 = sshll.u32 %s689_s1, 4  ;;  %s31_s17 = int_to_ptr.hbm [resolvable:$true] %s30_s17 }
   0x3   :  { %12 = vsyncpa [#allocation4], 0  ;;  %s576_s18 = smov [#allocation5]   ;;  %s17_s22 = sshll.u32 %s688_s0, 4  ;;  %s18_s22 = int_to_ptr.hbm [resolvable:$true] %s17_s22 }
   0x4   :  { %s32_s19 = sshll.u32 %s576_s18, 4  ;;  %s577_s23 = smov 256   ;;  %s33_s19 = int_to_ptr.vmem [resolvable:$true] %s32_s19 }
   0x5   :  { %s578_s24 = smov 16   ;;  %s579_s25 = smov [#allocation2]  }
   0x6   :  { %38 = dma.hbm_to_vmem [thread:$0]  %s31_s17, 1024, %s33_s19, [#allocation6], %s577_s23, %s577_s23, %s578_s24  }
   0x7   :  { %s19_s26 = sshll.u32 %s579_s25, 4  ;;  %s580_s1 = smov 128   ;;  %s20_s26 = int_to_ptr.vmem [resolvable:$true] %s19_s26 }
   0x8   :  { %s581_s27 = smov 8   ;;  %s44_s30 = sshll.u32 %s690_s2, 4  ;;  %s45_s30 = int_to_ptr.hbm [resolvable:$true] %s44_s30 }
   0x9   :  { %25 = dma.hbm_to_vmem [thread:$0]  %s18_s22, 512, %s20_s26, [#allocation3], %s580_s1, %s580_s1, %s581_s27  }
   0xa   :  { %s582_s5 = smov [#allocation7]   ;;  %s54_s8 = sshll.u32 %s691_s3, 4  ;;  %s55_s8 = int_to_ptr.hbm [resolvable:$true] %s54_s8 }
   0xb   :  { %s46_s0 = sshll.u32 %s582_s5, 4  ;;  %s583_s9 = smov [#allocation8]   ;;  %s47_s0 = int_to_ptr.vmem [resolvable:$true] %s46_s0 }
   0xc   :  { %49 = dma.hbm_to_vmem [thread:$0]  %s45_s30, 32, %s47_s0, [#allocation6]  }
   0xd   :  { %s56_s10 = sshll.u32 %s583_s9, 4  ;;  %s57_s10 = int_to_ptr.vmem [resolvable:$true] %s56_s10 }
   0xe   :  { %62 = dma.hbm_to_vmem [thread:$0]  %s55_s8, 512, %s57_s10, [#allocation9], %s577_s23, %s577_s23, %s578_s24  }
   0xf   :  { %568 = dma.done.wait [#allocation3], 512  }
  0x10   :  { %569 = vsyncadd [#allocation3], 4294966784 }
  0x11   :  { %570 = dma.done.wait [#allocation6], 1056  }
  0x12   :  { %571 = vsyncadd [#allocation6], 4294966240 }
  0x13   :  { %572 = dma.done.wait [#allocation9], 512  }
  0x14   :  { %573 = vsyncadd [#allocation9], 4294966784  ;;  %v87_v0 = vld [vmem:[#allocation5 + $0x30] sm:$0xff]  ;;  %v88_v1 = vld [vmem:[#allocation5 + $0x38] sm:$0xff]  ;;  %vm95_vm0 = vcmask 261120   ;;  %s584_s2 = smov [#allocation10]  }
  0x15   :  { %v85_v2 = vld [vmem:[#allocation5 + $0x20] sm:$0xff]  ;;  %114 = vmatpush.msra.mxu0 %v87_v0  ;;  %137 = vmatpush.msra.mxu1 %v88_v1  ;;  %v86_v3 = vld [vmem:[#allocation5 + $0x28] sm:$0xff]  ;;  %v83_v4 = vld [vmem:[#allocation5 + $0x10] sm:$0xff]  ;;  %s398_s3 = sshll.u32 %s584_s2, 4  ;;  %s400_s13 = sshll.u32 %s692_s4, 4  ;;  %s399_s3 = int_to_ptr.vmem [resolvable:$true] %s398_s3  ;;  %s401_s13 = int_to_ptr.hbm [resolvable:$true] %s400_s13 }
  0x16   :  { %271 = vmatpush.msra.mxu2 %v87_v0  ;;  %294 = vmatpush.msra.mxu3 %v88_v1  ;;  %v84_v5 = vld [vmem:[#allocation5 + $0x18] sm:$0xff]  ;;  %v81_v6 = vld [vmem:[#allocation5] sm:$0xff]  ;;  %v82_v7 = vld [vmem:[#allocation5 + $0x8] sm:$0xff] }
  0x17   :  { %115 = vmatpush.msra.mxu0 %v85_v2  ;;  %138 = vmatpush.msra.mxu1 %v86_v3  ;;  %v79_v8 = vld [vmem:[#allocation2] sm:$0xff]  ;;  %v237_v9 = vld [vmem:[#allocation2 + $0x10] sm:$0xff]  ;;  %v80_v10 = vld [vmem:[#allocation2 + $0x8] sm:$0xff] }
  0x18   :  { %272 = vmatpush.msra.mxu2 %v85_v2  ;;  %295 = vmatpush.msra.mxu3 %v86_v3  ;;  %v238_v11 = vld [vmem:[#allocation2 + $0x18] sm:$0xff]  ;;  %v89_v12 = vld [vmem:[#allocation7] sm:$0x3] }
  0x19   :  { %116 = vmatpush.msra.mxu0 %v83_v4  ;;  %139 = vmatpush.msra.mxu1 %v84_v5  ;;  %v91_v15 = vperm.slane %v89_v12, 0  ;;  %v92_v16 = vperm.slane %v89_v12, 1  ;;  %v247_v19 = vld [vmem:[#allocation7] sm:$0x3] }
  0x1a   :  { %273 = vmatpush.msra.mxu2 %v83_v4  ;;  %296 = vmatpush.msra.mxu3 %v84_v5  ;;  %v249_v26 = vperm.slane %v247_v19, 0  ;;  %v250_v27 = vperm.slane %v247_v19, 1 }
  0x1b   :  { %117 = vmatpush.msra.mxu0 %v81_v6  ;;  %140 = vmatpush.msra.mxu1 %v82_v7 }
  0x1c   :  { %274 = vmatpush.msra.mxu2 %v81_v6  ;;  %297 = vmatpush.msra.mxu3 %v82_v7 }
  0x1d   :  { %415 = vmatmul.msk.f32.vlgmr.msra.gmra.mxu0 %vm95_vm0, %v79_v8  ;;  %417 = vmatmul.msk.f32.vlgmr.msra.gmra.mxu1 %vm95_vm0, %v79_v8 }
  0x1e   :  { %419 = vmatmul.msk.f32.vlgmr.msra.gmra.mxu2 %vm95_vm0, %v237_v9  ;;  %421 = vmatmul.msk.f32.vlgmr.msra.gmra.mxu3 %vm95_vm0, %v237_v9 }
  0x25   :  { %416 = vmatmul.msk.f32.gmra.mxu0 %vm95_vm0, %v80_v10  ;;  %418 = vmatmul.msk.f32.gmra.mxu1 %vm95_vm0, %v80_v10 }
  0x26   :  { %420 = vmatmul.msk.f32.gmra.mxu2 %vm95_vm0, %v238_v11  ;;  %422 = vmatmul.msk.f32.gmra.mxu3 %vm95_vm0, %v238_v11 }
  0x9a   :  { %v119_v13 = vpop.f32.mrf.mxu0  ;;  %v142_v14 = vpop.f32.mrf.mxu1 }
  0x9b   :  { %v628_v17 = vadd.f32 %v119_v13, %v91_v15  ;;  %v630_v18 = vadd.f32 %v142_v14, %v92_v16 }
  0x9d   :  { %v148_v28 = vmul.f32 %v628_v17, %v628_v17  ;;  %v149_v29 = vmul.f32 %v630_v18, %v630_v18 }
  0xa1   :  { %v276_v20 = vpop.f32.mrf.mxu2  ;;  %v299_v21 = vpop.f32.mrf.mxu3 }
  0xa2   :  { %v122_v22 = vpop.f32.mrf.mxu0  ;;  %v145_v23 = vpop.f32.mrf.mxu1  ;;  %v644_v34 = vadd.f32 %v276_v20, %v249_v26  ;;  %v646_v35 = vadd.f32 %v299_v21, %v250_v27 }
  0xa3   :  { %v632_v24 = vadd.f32 %v122_v22, %v91_v15  ;;  %v634_v25 = vadd.f32 %v145_v23, %v92_v16 }
  0xa4   :  { %v305_v44 = vmul.f32 %v644_v34, %v644_v34  ;;  %v306_v45 = vmul.f32 %v646_v35, %v646_v35 }
  0xa5   :  { %v150_v30 = vmul.f32 %v632_v24, %v632_v24  ;;  %v151_v31 = vmul.f32 %v634_v25, %v634_v25 }
  0xa7   :  { %v152_v32 = vadd.f32 %v150_v30, %v148_v28  ;;  %v159_v33 = vadd.f32 %v151_v31, %v149_v29 }
  0xa9   :  { %v153_v36 = vrot.slane %v152_v32, 4  ;;  %v160_v37 = vrot.slane %v159_v33, 4  ;;  %v279_v38 = vpop.f32.mrf.mxu2  ;;  %v302_v39 = vpop.f32.mrf.mxu3 }
  0xaa   :  { %v648_v40 = vadd.f32 %v279_v38, %v249_v26  ;;  %v650_v41 = vadd.f32 %v302_v39, %v250_v27 }
  0xab   :  { %v154_v42 = vadd.f32 %v153_v36, %v152_v32  ;;  %v161_v43 = vadd.f32 %v160_v37, %v159_v33 }
  0xac   :  { %v307_v46 = vmul.f32 %v648_v40, %v648_v40  ;;  %v308_v47 = vmul.f32 %v650_v41, %v650_v41 }
  0xad   :  { %v155_v48 = vrot.slane %v154_v42, 2  ;;  %v162_v49 = vrot.slane %v161_v43, 2 }
  0xae   :  { %v309_v50 = vadd.f32 %v307_v46, %v305_v44  ;;  %v316_v51 = vadd.f32 %v308_v47, %v306_v45 }
  0xaf   :  { %v156_v52 = vadd.f32 %v155_v48, %v154_v42  ;;  %v163_v53 = vadd.f32 %v162_v49, %v161_v43 }
  0xb0   :  { %v310_v54 = vrot.slane %v309_v50, 4  ;;  %v317_v55 = vrot.slane %v316_v51, 4 }
  0xb1   :  { %v157_v56 = vrot.slane %v156_v52, 1  ;;  %v164_v57 = vrot.slane %v163_v53, 1 }
  0xb2   :  { %v311_v58 = vadd.f32 %v310_v54, %v309_v50  ;;  %v318_v59 = vadd.f32 %v317_v55, %v316_v51 }
  0xb3   :  { %v158_v60 = vadd.f32 %v157_v56, %v156_v52  ;;  %v165_v61 = vadd.f32 %v164_v57, %v163_v53 }
  0xb4   :  { %v312_v62 = vrot.slane %v311_v58, 2  ;;  %v319_v63 = vrot.slane %v318_v59, 2 }
  0xb5   :  { %432 = vrsqrt.f32 %v158_v60  ;;  %vm173_vm1 = vcmp.eq.f32.partialorder %v158_v60, inf  ;;  %vm175_vm2 = vcmp.eq.f32.partialorder %v158_v60, 0.0  ;;  %v176_v28 = vand.u32 2147483648, %v158_v60 }
  0xb6   :  { %434 = vrsqrt.f32 %v165_v61  ;;  %v313_v0 = vadd.f32 %v312_v62, %v311_v58  ;;  %v320_v1 = vadd.f32 %v319_v63, %v318_v59  ;;  %vm185_vm3 = vcmp.eq.f32.partialorder %v165_v61, inf }
  0xb7   :  { %v188_v32 = vand.u32 2147483648, %v165_v61  ;;  %vm187_vm4 = vcmp.eq.f32.partialorder %v165_v61, 0.0 }
  0xb8   :  { %v314_v2 = vrot.slane %v313_v0, 1  ;;  %v321_v3 = vrot.slane %v320_v1, 1 }
  0xba   :  { %v315_v5 = vadd.f32 %v314_v2, %v313_v0  ;;  %v322_v6 = vadd.f32 %v321_v3, %v320_v1 }
  0xbb   :  { %v433_v4 = vpop.eup %432 }
  0xbc   :  { %v435_v7 = vpop.eup %434  ;;  %v167_v8 = vmul.f32 %v433_v4, %v158_v60  ;;  %436 = vrsqrt.f32 %v315_v5  ;;  %vm330_vm5 = vcmp.eq.f32.partialorder %v315_v5, inf  ;;  %v333_v50 = vand.u32 2147483648, %v315_v5 }
  0xbd   :  { %v179_v9 = vmul.f32 %v435_v7, %v165_v61  ;;  %438 = vrsqrt.f32 %v322_v6  ;;  %vm342_vm6 = vcmp.eq.f32.partialorder %v322_v6, inf  ;;  %v345_v51 = vand.u32 2147483648, %v322_v6 }
  0xbe   :  { %v168_v10 = vmul.f32 %v433_v4, %v167_v8  ;;  %vm332_vm7 = vcmp.eq.f32.partialorder %v315_v5, 0.0  ;;  %vm344_vm8 = vcmp.eq.f32.partialorder %v322_v6, 0.0 }
  0xbf   :  { %v180_v11 = vmul.f32 %v435_v7, %v179_v9 }
  0xc0   :  { %v169_v12 = vmul.f32 0.5, %v168_v10 }
  0xc1   :  { %v181_v13 = vmul.f32 0.5, %v180_v11 }
  0xc2   :  { %v170_v14 = vsub.f32 1.5, %v169_v12  ;;  %v437_v15 = vpop.eup %436 }
  0xc3   :  { %v182_v16 = vsub.f32 1.5, %v181_v13  ;;  %v439_v19 = vpop.eup %438  ;;  %v324_v21 = vmul.f32 %v437_v15, %v315_v5  ;;  %v224_v13 = vld [vmem:[#allocation8] sm:$0xff] }
  0xc4   :  { %v171_v20 = vmul.f32 %v433_v4, %v170_v14  ;;  %v336_v23 = vmul.f32 %v439_v19, %v322_v6  ;;  %v226_v14 = vld [vmem:[#allocation8 + $0x10] sm:$0xff] }
  0xc5   :  { %v183_v22 = vmul.f32 %v435_v7, %v182_v16  ;;  %v325_v27 = vmul.f32 %v437_v15, %v324_v21 }
  0xc6   :  { %v172_v26 = vmul.f32 %v171_v20, %v158_v60  ;;  %v337_v30 = vmul.f32 %v439_v19, %v336_v23  ;;  %v227_v23 = vld [vmem:[#allocation8 + $0x18] sm:$0xff] }
  0xc7   :  { %v184_v29 = vmul.f32 %v183_v22, %v165_v61  ;;  %v326_v33 = vmul.f32 0.5, %v325_v27  ;;  %v225_v22 = vld [vmem:[#allocation8 + $0x8] sm:$0xff] }
  0xc8   :  { %v174_v31 = vsel %vm173_vm1, %v158_v60, %v172_v26  ;;  %v338_v38 = vmul.f32 0.5, %v337_v30 }
  0xc9   :  { %v177_v36 = vsel %vm175_vm2, %v176_v28, %v174_v31  ;;  %v186_v37 = vsel %vm185_vm3, %v165_v61, %v184_v29  ;;  %v327_v43 = vsub.f32 1.5, %v326_v33 }
  0xca   :  { %v190_v39 = vmax.f32 %v177_v36, 1e-12  ;;  %v189_v42 = vsel %vm187_vm4, %v188_v32, %v186_v37  ;;  %v339_v45 = vsub.f32 1.5, %v338_v38 }
  0xcb   :  { %v191_v44 = vmax.f32 %v189_v42, 1e-12  ;;  %v328_v46 = vmul.f32 %v437_v15, %v327_v43 }
  0xcc   :  { %440 = vrcp.f32 %v190_v39  ;;  %v340_v47 = vmul.f32 %v439_v19, %v339_v45  ;;  %v201_v63 = vand.u32 2147483647, %v190_v39  ;;  %v203_v0 = vand.u32 2147483648, %v190_v39 }
  0xcd   :  { %442 = vrcp.f32 %v191_v44  ;;  %v329_v48 = vmul.f32 %v328_v46, %v315_v5  ;;  %v218_v3 = vand.u32 2147483648, %v191_v44  ;;  %vm197_vm11 = vweird.f32 %v190_v39 }
  0xce   :  { %v341_v49 = vmul.f32 %v340_v47, %v322_v6  ;;  %v204_v7 = vor.u32 1.1754944e-38, %v203_v0  ;;  %vm212_vm13 = vweird.f32 %v191_v44  ;;  %vm202_vm14 = vcmp.eq.f32.partialorder %v201_v63, 8.507059e+37 }
  0xcf   :  { %v331_v53 = vsel %vm330_vm5, %v315_v5, %v329_v48  ;;  %v216_v5 = vand.u32 2147483647, %v191_v44  ;;  %v219_v10 = vor.u32 1.1754944e-38, %v218_v3 }
  0xd0   :  { %v343_v54 = vsel %vm342_vm6, %v322_v6, %v341_v49  ;;  %v334_v57 = vsel %vm332_vm7, %v333_v50, %v331_v53 }
  0xd1   :  { %v346_v58 = vsel %vm344_vm8, %v345_v51, %v343_v54  ;;  %v660_v60 = vmax.f32 %v334_v57, 1e-12  ;;  %vm217_vm0 = vcmp.eq.f32.partialorder %v216_v5, 8.507059e+37 }
  0xd2   :  { %v441_v52 = vpop.eup %440  ;;  %v662_v61 = vmax.f32 %v346_v58, 1e-12 }
  0xd3   :  { %v443_v55 = vpop.eup %442  ;;  %v193_v56 = vmul.f32 %v441_v52, %v190_v39  ;;  %444 = vrcp.f32 %v660_v60  ;;  %vm198_vm9 = vweird.f32 %v441_v52  ;;  %v358_v38 = vand.u32 2147483647, %v660_v60 }
  0xd4   :  { %v208_v59 = vmul.f32 %v443_v55, %v191_v44  ;;  %446 = vrcp.f32 %v662_v61  ;;  %vm213_vm10 = vweird.f32 %v443_v55  ;;  %vm199_vm12 = vmor %vm197_vm11, %vm198_vm9  ;;  %v375_v39 = vand.u32 2147483648, %v662_v61 }
  0xd5   :  { %v194_v62 = vsub.f32 1.0, %v193_v56  ;;  %vm214_vm15 = vmor %vm212_vm13, %vm213_vm10  ;;  %vm354_vm3 = vweird.f32 %v660_v60  ;;  %vm369_vm5 = vweird.f32 %v662_v61  ;;  %vm359_vm6 = vcmp.eq.f32.partialorder %v358_v38, 8.507059e+37 }
  0xd6   :  { %v209_v1 = vsub.f32 1.0, %v208_v59  ;;  %v376_v46 = vor.u32 1.1754944e-38, %v375_v39 }
  0xd7   :  { %v195_v2 = vmul.f32 %v441_v52, %v194_v62 }
  0xd8   :  { %v210_v4 = vmul.f32 %v443_v55, %v209_v1 }
  0xd9   :  { %v196_v6 = vadd.f32 %v441_v52, %v195_v2  ;;  %v445_v11 = vpop.eup %444 }
  0xda   :  { %v211_v8 = vadd.f32 %v443_v55, %v210_v4  ;;  %v447_v16 = vpop.eup %446  ;;  %v350_v26 = vmul.f32 %v445_v11, %v660_v60  ;;  %vm355_vm1 = vweird.f32 %v445_v11 }
  0xdb   :  { %v200_v9 = vsel %vm199_vm12, %v441_v52, %v196_v6  ;;  %v365_v29 = vmul.f32 %v447_v16, %v662_v61  ;;  %vm370_vm2 = vweird.f32 %v447_v16  ;;  %vm356_vm4 = vmor %vm354_vm3, %vm355_vm1 }
  0xdc   :  { %v205_v12 = vsel %vm202_vm14, %v204_v7, %v200_v9  ;;  %v215_v15 = vsel %vm214_vm15, %v443_v55, %v211_v8  ;;  %v351_v32 = vsub.f32 1.0, %v350_v26  ;;  %vm371_vm7 = vmor %vm369_vm5, %vm370_vm2 }
  0xdd   :  { %v206_v19 = vmul.f32 %v205_v12, %v628_v17  ;;  %v222_v20 = vmul.f32 %v205_v12, %v632_v24  ;;  %v220_v21 = vsel %vm217_vm0, %v219_v10, %v215_v15  ;;  %v360_v17 = vand.u32 2147483648, %v660_v60 }
  0xde   :  { %v221_v27 = vmul.f32 %v220_v21, %v630_v18  ;;  %v223_v28 = vmul.f32 %v220_v21, %v634_v25  ;;  %v366_v37 = vsub.f32 1.0, %v365_v29  ;;  %v352_v24 = vmul.f32 %v445_v11, %v351_v32 }
  0xdf   :  { %v228_v30 = vadd.f32 %v224_v13, %v206_v19  ;;  %v230_v31 = vadd.f32 %v226_v14, %v222_v20  ;;  %v373_v25 = vand.u32 2147483647, %v662_v61  ;;  %v361_v43 = vor.u32 1.1754944e-38, %v360_v17 }
  0xe0   :  { %v229_v33 = vadd.f32 %v225_v22, %v221_v27  ;;  %v231_v36 = vadd.f32 %v227_v23, %v223_v28  ;;  %v367_v18 = vmul.f32 %v447_v16, %v366_v37  ;;  %v353_v42 = vadd.f32 %v445_v11, %v352_v24 }
  0xe1   :  { %232 = vst [vmem:[#allocation10] sm:$0xff] %v228_v30  ;;  %vm374_vm8 = vcmp.eq.f32.partialorder %v373_v25, 8.507059e+37 }
  0xe2   :  { %234 = vst [vmem:[#allocation10 + $0x10] sm:$0xff] %v230_v31  ;;  %v368_v44 = vadd.f32 %v447_v16, %v367_v18  ;;  %v357_v45 = vsel %vm356_vm4, %v445_v11, %v353_v42 }
  0xe3   :  { %233 = vst [vmem:[#allocation10 + $0x8] sm:$0xff] %v229_v33  ;;  %v362_v47 = vsel %vm359_vm6, %v361_v43, %v357_v45 }
  0xe4   :  { %235 = vst [vmem:[#allocation10 + $0x18] sm:$0xff] %v231_v36  ;;  %v372_v48 = vsel %vm371_vm7, %v447_v16, %v368_v44  ;;  %v363_v49 = vmul.f32 %v362_v47, %v644_v34  ;;  %v379_v50 = vmul.f32 %v362_v47, %v648_v40 }
  0xe5   :  { %v377_v51 = vsel %vm374_vm8, %v376_v46, %v372_v48 }
  0xe6   :  { %v378_v52 = vmul.f32 %v377_v51, %v646_v35  ;;  %v380_v53 = vmul.f32 %v377_v51, %v650_v41  ;;  %v385_v54 = vadd.f32 %v363_v49, %v224_v13  ;;  %v387_v55 = vadd.f32 %v379_v50, %v226_v14 }
  0xe8   :  { %v386_v56 = vadd.f32 %v378_v52, %v225_v22  ;;  %v388_v57 = vadd.f32 %v380_v53, %v227_v23  ;;  %390 = vst [vmem:[#allocation10 + $0x20] sm:$0xff] %v385_v54 }
  0xe9   :  { %392 = vst [vmem:[#allocation10 + $0x30] sm:$0xff] %v387_v55 }
  0xea   :  { %391 = vst [vmem:[#allocation10 + $0x28] sm:$0xff] %v386_v56 }
  0xeb   :  { %393 = vst [vmem:[#allocation10 + $0x38] sm:$0xff] %v388_v57 }
  0xec   :  { %406 = dma.vmem_to_hbm [thread:$0]  %s399_s3, 1024, %s401_s13, [#allocation4], %s577_s23, %s577_s23, %s578_s24  }
  0xed   :  { %574 = dma.done.wait [#allocation4], 1024  }
  0xee   :  { %575 = vsyncadd [#allocation4], 4294966272 }
  0xef   :  { %411 = vsyncpa [#allocation3], 1 }
  0xf0   :  { %412 = vsyncpa [#allocation6], 1 }
  0xf1   :  { %413 = vsyncpa [#allocation9], 1 }
  0xf2   :  { %414 = vsyncpa [#allocation4], 1 }

</bundles_post_ra>
